<compile_context>
chip_gen: v5e
topology: v5e:2x2
jax: 0.10.0
libtpu: 0.0.40
codegen_flags: <defaults>
</compile_context>

<pallas_src>
import jax
import jax.numpy as jnp
from jax.experimental import pallas as pl
from jax.experimental.pallas import tpu as pltpu


def mlp_two_kernel(x_ref, w1_ref, w2_ref, w3_ref, w4_ref, w5_ref, o_ref):
    # Cast f32 activations to bf16 just before the MXU (hidden under DMA
    # slack); all matmuls accumulate in f32, ReLU runs on the f32 accumulator,
    # then narrows back to bf16 for the next MXU feed.
    h = x_ref[...].astype(jnp.bfloat16)
    h = jnp.dot(h, w1_ref[...], preferred_element_type=jnp.float32)
    h = jnp.maximum(h, 0.0).astype(jnp.bfloat16)
    h = jnp.dot(h, w2_ref[...], preferred_element_type=jnp.float32)
    h = jnp.maximum(h, 0.0).astype(jnp.bfloat16)
    h = jnp.dot(h, w3_ref[...], preferred_element_type=jnp.float32)
    h = jnp.maximum(h, 0.0).astype(jnp.bfloat16)
    h = jnp.dot(h, w4_ref[...], preferred_element_type=jnp.float32)
    h = jnp.maximum(h, 0.0).astype(jnp.bfloat16)
    h = jnp.dot(h, w5_ref[...], preferred_element_type=jnp.float32)
    o_ref[...] = h.astype(o_ref.dtype)


def prepare_params(w1, w2, w3, w4, w5, dtype=jnp.bfloat16):
    """One-time parameter prep (NOT on the per-call hot path).

    PyTorch nn.Linear stores (out, in); transpose to (in, out) so the kernel
    computes y = x @ W with no transpose op, and cast to bf16 for the MXU.
    """
    return tuple(jnp.asarray(w.T, dtype=dtype) for w in (w1, w2, w3, w4, w5))


def _round_up(a, m):
    return ((a + m - 1) // m) * m


def mlp_two(x, params, tile_b=2048):
    """x: (B, 784), native dtype (f32 ok); params: prepared (in, out) bf16 weights."""
    B, in_f = x.shape
    w1t, w2t, w3t, w4t, w5t = params
    out_f = w5t.shape[1]

    # --- Batch tiling -------------------------------------------------------
    # Fixed tile size; pad B up to a multiple of it (zeros propagate harmlessly
    # through the bias-free net and are sliced off at the end).
    tb = tile_b
    # Keep >= ~8 grid steps when B is large enough so v7x's 2 TCs both get
    # work and DMA/compute overlap is preserved per core.
    tb = min(tb, max(256, _round_up(pl.cdiv(B, 8), 16)))
    # Never larger than the (padded) batch; multiple of 16 for bf16 sublanes.
    tb = max(16, min(tb, _round_up(B, 16)))
    Bp = _round_up(B, tb)
    if Bp != B:
        x = jnp.pad(x, ((0, Bp - B), (0, 0)))
    grid = (Bp // tb,)

    # --- Cost estimate (keeps XLA's overlap scheduling honest) --------------
    layer_dims = [(w.shape[0], w.shape[1]) for w in params]
    flops = 2 * Bp * sum(i * o for i, o in layer_dims)
    bytes_accessed = int(
        sum(w.size * w.dtype.itemsize for w in params)
        + Bp * in_f * x.dtype.itemsize       # x read in native dtype
        + Bp * out_f * 2                      # bf16 output writeback
    )
    cost = pl.CostEstimate(
        flops=flops, transcendentals=0, bytes_accessed=bytes_accessed)

    # --- VMEM budget: 2x(in block) + 2x(out block) + 2x(weights) + headroom --
    in_block_bytes = tb * in_f * x.dtype.itemsize
    out_block_bytes = tb * out_f * 2
    w_bytes = sum(w.size * w.dtype.itemsize for w in params)
    vmem_bytes = 2 * (in_block_bytes + out_block_bytes + w_bytes) + (4 << 20)

    out = pl.pallas_call(
        mlp_two_kernel,
        out_shape=jax.ShapeDtypeStruct((Bp, out_f), jnp.bfloat16),
        grid=grid,
        in_specs=[
            pl.BlockSpec((tb, in_f), lambda i: (i, 0)),         # x: batch-tiled
            pl.BlockSpec(w1t.shape, lambda i: (0, 0)),          # weights: VMEM-resident
            pl.BlockSpec(w2t.shape, lambda i: (0, 0)),
            pl.BlockSpec(w3t.shape, lambda i: (0, 0)),
            pl.BlockSpec(w4t.shape, lambda i: (0, 0)),
            pl.BlockSpec(w5t.shape, lambda i: (0, 0)),
        ],
        out_specs=pl.BlockSpec((tb, out_f), lambda i: (i, 0)),
        compiler_params=pltpu.CompilerParams(
            dimension_semantics=("parallel",),
            vmem_limit_bytes=int(vmem_bytes)),
        cost_estimate=cost,
    )(x, w1t, w2t, w3t, w4t, w5t)

    return out[:B] if Bp != B else out


def _init_linear_weight(key, out_features, in_features):
    # Deterministic init mimicking PyTorch's default: U(-1/sqrt(in), 1/sqrt(in)).
    bound = 1.0 / jnp.sqrt(jnp.float32(in_features))
    return jax.random.uniform(
        key, (out_features, in_features), dtype=jnp.float32,
        minval=-bound, maxval=bound)


def _reference(x, params):
    """f32 reference mirroring the kernel's bf16 operand rounding."""
    h = x.astype(jnp.bfloat16).astype(jnp.float32)
    *hidden, last = params
    for w in hidden:
        h = jnp.maximum(h @ w.astype(jnp.float32), 0.0)
        h = h.astype(jnp.bfloat16).astype(jnp.float32)
    return h @ last.astype(jnp.float32)


if __name__ == "__main__":
    key = jax.random.PRNGKey(0)
    kx, k1, k2, k3, k4, k5 = jax.random.split(key, 6)

    B = 8
    x = jax.random.normal(kx, (B, 784), dtype=jnp.float32)

    w1 = _init_linear_weight(k1, 128, 784)
    w2 = _init_linear_weight(k2, 64, 128)
    w3 = _init_linear_weight(k3, 32, 64)
    w4 = _init_linear_weight(k4, 16, 32)
    w5 = _init_linear_weight(k5, 10, 16)

    params = prepare_params(w1, w2, w3, w4, w5)

    out = mlp_two(x, params)
    out = jax.block_until_ready(out)

    ref = _reference(x, params)
    assert out.shape == (B, 10), out.shape
    err = jnp.max(jnp.abs(out.astype(jnp.float32) - ref))
    assert jnp.allclose(out.astype(jnp.float32), ref, atol=2e-2, rtol=1e-2), float(err)

    print("KERNEL_OK")
</pallas_src>

<mosaic_0001>
module attributes {stable_mosaic.version = 11 : i64} {
  func.func @mlp_two_kernel(%arg0: i32, %arg1: memref<16x784xf32, #tpu.memory_space<vmem>>, %arg2: memref<784x128xbf16, #tpu.memory_space<vmem>>, %arg3: memref<128x64xbf16, #tpu.memory_space<vmem>>, %arg4: memref<64x32xbf16, #tpu.memory_space<vmem>>, %arg5: memref<32x16xbf16, #tpu.memory_space<vmem>>, %arg6: memref<16x10xbf16, #tpu.memory_space<vmem>>, %arg7: memref<16x10xbf16, #tpu.memory_space<vmem>>) attributes {dimension_semantics = [#tpu.dimension_semantics<parallel>], iteration_bounds = array<i64: 1>, scalar_prefetch = 0 : i64, scratch_operands = 0 : i64, tpu.core_type = #tpu.core_type<tc>, window_params = [{transform_indices = @transform_0, window_bounds = array<i64: 16, 784>}, {pipeline_mode = #tpu.pipeline_mode<synchronous>, transform_indices = @transform_1, window_bounds = array<i64: 784, 128>}, {pipeline_mode = #tpu.pipeline_mode<synchronous>, transform_indices = @transform_2, window_bounds = array<i64: 128, 64>}, {pipeline_mode = #tpu.pipeline_mode<synchronous>, transform_indices = @transform_3, window_bounds = array<i64: 64, 32>}, {pipeline_mode = #tpu.pipeline_mode<synchronous>, transform_indices = @transform_4, window_bounds = array<i64: 32, 16>}, {pipeline_mode = #tpu.pipeline_mode<synchronous>, transform_indices = @transform_5, window_bounds = array<i64: 16, 10>}, {transform_indices = @transform_6, window_bounds = array<i64: 16, 10>}]} {
    %c0 = arith.constant 0 : index
    %c0_0 = arith.constant 0 : index
    %0 = vector.load %arg1[%c0, %c0_0] : memref<16x784xf32, #tpu.memory_space<vmem>>, vector<16x784xf32>
    %1 = arith.truncf %0 : vector<16x784xf32> to vector<16x784xbf16>
    %c0_1 = arith.constant 0 : index
    %c0_2 = arith.constant 0 : index
    %2 = vector.load %arg2[%c0_1, %c0_2] : memref<784x128xbf16, #tpu.memory_space<vmem>>, vector<784x128xbf16>
    %cst = arith.constant dense<0.000000e+00> : vector<16x128xf32>
    %3 = tpu.matmul %1, %2, %cst {dimension_numbers = #tpu.dot_dimension_numbers<[1], [0], [0], [1], [0, 0, 1, 1], [], []>} : vector<16x784xbf16>, vector<784x128xbf16>, vector<16x128xf32> -> vector<16x128xf32>
    %cst_3 = arith.constant 0.000000e+00 : f32
    %4 = vector.broadcast %cst_3 : f32 to vector<16x128xf32>
    %5 = arith.maximumf %3, %4 : vector<16x128xf32>
    %6 = arith.truncf %5 : vector<16x128xf32> to vector<16x128xbf16>
    %c0_4 = arith.constant 0 : index
    %c0_5 = arith.constant 0 : index
    %7 = vector.load %arg3[%c0_4, %c0_5] : memref<128x64xbf16, #tpu.memory_space<vmem>>, vector<128x64xbf16>
    %cst_6 = arith.constant dense<0.000000e+00> : vector<16x64xf32>
    %8 = tpu.matmul %6, %7, %cst_6 {dimension_numbers = #tpu.dot_dimension_numbers<[1], [0], [0], [1], [0, 0, 1, 1], [], []>} : vector<16x128xbf16>, vector<128x64xbf16>, vector<16x64xf32> -> vector<16x64xf32>
    %cst_7 = arith.constant 0.000000e+00 : f32
    %9 = vector.broadcast %cst_7 : f32 to vector<16x64xf32>
    %10 = arith.maximumf %8, %9 : vector<16x64xf32>
    %11 = arith.truncf %10 : vector<16x64xf32> to vector<16x64xbf16>
    %c0_8 = arith.constant 0 : index
    %c0_9 = arith.constant 0 : index
    %12 = vector.load %arg4[%c0_8, %c0_9] : memref<64x32xbf16, #tpu.memory_space<vmem>>, vector<64x32xbf16>
    %cst_10 = arith.constant dense<0.000000e+00> : vector<16x32xf32>
    %13 = tpu.matmul %11, %12, %cst_10 {dimension_numbers = #tpu.dot_dimension_numbers<[1], [0], [0], [1], [0, 0, 1, 1], [], []>} : vector<16x64xbf16>, vector<64x32xbf16>, vector<16x32xf32> -> vector<16x32xf32>
    %cst_11 = arith.constant 0.000000e+00 : f32
    %14 = vector.broadcast %cst_11 : f32 to vector<16x32xf32>
    %15 = arith.maximumf %13, %14 : vector<16x32xf32>
    %16 = arith.truncf %15 : vector<16x32xf32> to vector<16x32xbf16>
    %c0_12 = arith.constant 0 : index
    %c0_13 = arith.constant 0 : index
    %17 = vector.load %arg5[%c0_12, %c0_13] : memref<32x16xbf16, #tpu.memory_space<vmem>>, vector<32x16xbf16>
    %cst_14 = arith.constant dense<0.000000e+00> : vector<16x16xf32>
    %18 = tpu.matmul %16, %17, %cst_14 {dimension_numbers = #tpu.dot_dimension_numbers<[1], [0], [0], [1], [0, 0, 1, 1], [], []>} : vector<16x32xbf16>, vector<32x16xbf16>, vector<16x16xf32> -> vector<16x16xf32>
    %cst_15 = arith.constant 0.000000e+00 : f32
    %19 = vector.broadcast %cst_15 : f32 to vector<16x16xf32>
    %20 = arith.maximumf %18, %19 : vector<16x16xf32>
    %21 = arith.truncf %20 : vector<16x16xf32> to vector<16x16xbf16>
    %c0_16 = arith.constant 0 : index
    %c0_17 = arith.constant 0 : index
    %22 = vector.load %arg6[%c0_16, %c0_17] : memref<16x10xbf16, #tpu.memory_space<vmem>>, vector<16x10xbf16>
    %cst_18 = arith.constant dense<0.000000e+00> : vector<16x10xf32>
    %23 = tpu.matmul %21, %22, %cst_18 {dimension_numbers = #tpu.dot_dimension_numbers<[1], [0], [0], [1], [0, 0, 1, 1], [], []>} : vector<16x16xbf16>, vector<16x10xbf16>, vector<16x10xf32> -> vector<16x10xf32>
    %24 = arith.truncf %23 : vector<16x10xf32> to vector<16x10xbf16>
    %c0_19 = arith.constant 0 : index
    %c0_20 = arith.constant 0 : index
    %25 = vector.load %arg7[%c0_19, %c0_20] : memref<16x10xbf16, #tpu.memory_space<vmem>>, vector<16x10xbf16>
    tpu.vector_store %arg7[%c0_19, %c0_20], %24 {strides = array<i32>} : memref<16x10xbf16, #tpu.memory_space<vmem>>, vector<16x10xbf16>,
    return
  }
  func.func @transform_0(%arg0: i32) -> (i32, i32) {
    %c0_i32 = arith.constant 0 : i32
    %c0_i32_0 = arith.constant 0 : i32
    return %arg0, %c0_i32 : i32, i32
  }
  func.func @transform_1(%arg0: i32) -> (i32, i32) {
    %c0_i32 = arith.constant 0 : i32
    %c0_i32_0 = arith.constant 0 : i32
    %c0_i32_1 = arith.constant 0 : i32
    return %c0_i32, %c0_i32_0 : i32, i32
  }
  func.func @transform_2(%arg0: i32) -> (i32, i32) {
    %c0_i32 = arith.constant 0 : i32
    %c0_i32_0 = arith.constant 0 : i32
    %c0_i32_1 = arith.constant 0 : i32
    return %c0_i32, %c0_i32_0 : i32, i32
  }
  func.func @transform_3(%arg0: i32) -> (i32, i32) {
    %c0_i32 = arith.constant 0 : i32
    %c0_i32_0 = arith.constant 0 : i32
    %c0_i32_1 = arith.constant 0 : i32
    return %c0_i32, %c0_i32_0 : i32, i32
  }
  func.func @transform_4(%arg0: i32) -> (i32, i32) {
    %c0_i32 = arith.constant 0 : i32
    %c0_i32_0 = arith.constant 0 : i32
    %c0_i32_1 = arith.constant 0 : i32
    return %c0_i32, %c0_i32_0 : i32, i32
  }
  func.func @transform_5(%arg0: i32) -> (i32, i32) {
    %c0_i32 = arith.constant 0 : i32
    %c0_i32_0 = arith.constant 0 : i32
    %c0_i32_1 = arith.constant 0 : i32
    return %c0_i32, %c0_i32_0 : i32, i32
  }
  func.func @transform_6(%arg0: i32) -> (i32, i32) {
    %c0_i32 = arith.constant 0 : i32
    %c0_i32_0 = arith.constant 0 : i32
    return %arg0, %c0_i32 : i32, i32
  }
}

</mosaic_0001>

<bundles_post_ra>
// kernel: tpu_custom_call.1
= control target key start
LH: loop header
LB: loop body
LE: loop exit
PB: predicated region body
PF: predicated region fallthrough
CT: control target
= control target key end

     0   :  { %11 = vsyncpa [#allocation3], 0  ;;  %s1299_s0 = inlined_call_operand.vmem [shape: f32[16,784], index: 0, kind: input, shape index: {}]   ;;  %s1300_s1 = inlined_call_operand.hbm [shape: bf16[784,128], index: 1, kind: input, shape index: {}]   ;;  %s1301_s2 = inlined_call_operand.vmem [shape: bf16[128,64], index: 2, kind: input, shape index: {}]   ;;  %s1302_s3 = inlined_call_operand.vmem [shape: bf16[64,32], index: 3, kind: input, shape index: {}]   ;;  %s1303_s4 = inlined_call_operand.vmem [shape: bf16[32,16], index: 4, kind: input, shape index: {}]   ;;  %s1304_s5 = inlined_call_operand.vmem [shape: bf16[16,10], index: 5, kind: input, shape index: {}]   ;;  %s1305_s6 = inlined_call_operand.hbm [shape: bf16[16,10], index: 6, kind: output, shape index: {}]  }
   0x1   :  { %12 = vsyncpa [#allocation4], 0  ;;  %s19_s23 = sshll.u32 %s1300_s1, 4  ;;  %s1159_s24 = smov [#allocation2]   ;;  %s20_s23 = int_to_ptr.hbm [resolvable:$true] %s19_s23 }
   0x2   :  { %s21_s25 = sshll.u32 %s1159_s24, 4  ;;  %s1160_s26 = smov 64   ;;  %s22_s25 = int_to_ptr.vmem [resolvable:$true] %s21_s25 }
   0x3   :  { %s1161_s27 = smov 4  }
   0x4   :  { %27 = dma.hbm_to_vmem [thread:$0]  %s20_s23, 6272, %s22_s25, [#allocation3], %s1160_s26, %s1160_s26, %s1161_s27  }
   0x5   :  { %1155 = dma.done.wait [#allocation3], 6272  }
   0x6   :  { %1156 = vsyncadd [#allocation3], 4294961024  ;;  %v1046_v0 = vld [vmem:[#allocation2 + $0x38] sm:$0xff]  ;;  %v1045_v4 = vld [vmem:[#allocation2 + $0x30] sm:$0xff]  ;;  %vm454_vm0 = vcmask 130048   ;;  %vm672_vm1 = vcmask 523264  }
   0x7   :  { %v1054_v1 = vld [vmem:[#allocation2 + $0x78] sm:$0xff]  ;;  %458 = vmatpush.bf16.msra.mxu0 %v1046_v0  ;;  %v1053_v5 = vld [vmem:[#allocation2 + $0x70] sm:$0xff]  ;;  %v1044_v8 = vld [vmem:[#allocation2 + $0x28] sm:$0xff]  ;;  %vm709_vm2 = vcmask 261120   ;;  %vm757_vm3 = vcmask 76800  }
   0x8   :  { %v1062_v2 = vld [vmem:[#allocation2 + $0xb8] sm:$0xff]  ;;  %472 = vmatpush.bf16.msra.mxu1 %v1054_v1  ;;  %v1061_v6 = vld [vmem:[#allocation2 + $0xb0] sm:$0xff]  ;;  %v1052_v9 = vld [vmem:[#allocation2 + $0x68] sm:$0xff] }
   0x9   :  { %v1070_v3 = vld [vmem:[#allocation2 + $0xf8] sm:$0xff]  ;;  %486 = vmatpush.bf16.msra.mxu2 %v1062_v2  ;;  %v1069_v7 = vld [vmem:[#allocation2 + $0xf0] sm:$0xff]  ;;  %v1060_v10 = vld [vmem:[#allocation2 + $0xa8] sm:$0xff] }
   0xa   :  { %500 = vmatpush.bf16.msra.mxu3 %v1070_v3  ;;  %v1068_v11 = vld [vmem:[#allocation2 + $0xe8] sm:$0xff]  ;;  %v1043_v12 = vld [vmem:[#allocation2 + $0x20] sm:$0xff]  ;;  %v1042_v16 = vld [vmem:[#allocation2 + $0x18] sm:$0xff] }
   0xb   :  { %459 = vmatpush.bf16.msra.mxu0 %v1045_v4  ;;  %v1051_v13 = vld [vmem:[#allocation2 + $0x60] sm:$0xff]  ;;  %v1050_v17 = vld [vmem:[#allocation2 + $0x58] sm:$0xff]  ;;  %v1041_v20 = vld [vmem:[#allocation2 + $0x10] sm:$0xff] }
   0xc   :  { %473 = vmatpush.bf16.msra.mxu1 %v1053_v5  ;;  %v1059_v14 = vld [vmem:[#allocation2 + $0xa0] sm:$0xff]  ;;  %v1058_v18 = vld [vmem:[#allocation2 + $0x98] sm:$0xff]  ;;  %v1049_v21 = vld [vmem:[#allocation2 + $0x50] sm:$0xff] }
   0xd   :  { %487 = vmatpush.bf16.msra.mxu2 %v1061_v6  ;;  %v1067_v15 = vld [vmem:[#allocation2 + $0xe0] sm:$0xff]  ;;  %v1066_v19 = vld [vmem:[#allocation2 + $0xd8] sm:$0xff]  ;;  %v1057_v22 = vld [vmem:[#allocation2 + $0x90] sm:$0xff] }
   0xe   :  { %501 = vmatpush.bf16.msra.mxu3 %v1069_v7  ;;  %v1065_v23 = vld [vmem:[#allocation2 + $0xd0] sm:$0xff]  ;;  %v1040_v24 = vld [vmem:[#allocation2 + $0x8] sm:$0xff]  ;;  %v1039_v28 = vld [vmem:[#allocation2] sm:$0xff] }
   0xf   :  { %460 = vmatpush.bf16.msra.mxu0 %v1044_v8  ;;  %v1048_v25 = vld [vmem:[#allocation2 + $0x48] sm:$0xff]  ;;  %v1047_v29 = vld [vmem:[#allocation2 + $0x40] sm:$0xff]  ;;  %v1078_v31 = vld [vmem:[#allocation2 + $0x138] sm:$0xff] }
  0x10   :  { %474 = vmatpush.bf16.msra.mxu1 %v1052_v9  ;;  %v1056_v26 = vld [vmem:[#allocation2 + $0x88] sm:$0xff]  ;;  %v1055_v30 = vld [vmem:[#allocation2 + $0x80] sm:$0xff]  ;;  %v48_v33 = vld [vmem:[%s1299_s0 + $0x38] sm:$0xff] }
  0x11   :  { %488 = vmatpush.bf16.msra.mxu2 %v1060_v10  ;;  %v1064_v27 = vld [vmem:[#allocation2 + $0xc8] sm:$0xff]  ;;  %v41_v32 = vld [vmem:[%s1299_s0] sm:$0xff]  ;;  %v1086_v36 = vld [vmem:[#allocation2 + $0x178] sm:$0xff] }
  0x12   :  { %502 = vmatpush.bf16.msra.mxu3 %v1068_v11  ;;  %v42_v34 = vld [vmem:[%s1299_s0 + $0x8] sm:$0xff]  ;;  %v49_v35 = vld [vmem:[%s1299_s0 + $0x40] sm:$0xff]  ;;  %v43_v37 = vld [vmem:[%s1299_s0 + $0x10] sm:$0xff]  ;;  %v55_v42 = vpack.c.bf16 %v48_v33, %v41_v32 }
  0x13   :  { %461 = vmatpush.bf16.msra.mxu0 %v1043_v12  ;;  %v50_v38 = vld [vmem:[%s1299_s0 + $0x48] sm:$0xff]  ;;  %v1063_v39 = vld [vmem:[#allocation2 + $0xc0] sm:$0xff]  ;;  %v44_v40 = vld [vmem:[%s1299_s0 + $0x18] sm:$0xff]  ;;  %v56_v43 = vpack.c.bf16 %v49_v35, %v42_v34 }
  0x14   :  { %475 = vmatpush.bf16.msra.mxu1 %v1051_v13  ;;  %v51_v41 = vld [vmem:[%s1299_s0 + $0x50] sm:$0xff]  ;;  %v57_v44 = vpack.c.bf16 %v50_v38, %v43_v37  ;;  %v1087_v48 = vld [vmem:[#allocation2 + $0x180] sm:$0xff]  ;;  %v1076_v49 = vld [vmem:[#allocation2 + $0x128] sm:$0xff] }
  0x15   :  { %489 = vmatpush.bf16.msra.mxu2 %v1059_v14  ;;  %v1077_v45 = vld [vmem:[#allocation2 + $0x130] sm:$0xff]  ;;  %v58_v46 = vpack.c.bf16 %v51_v41, %v44_v40  ;;  %v1084_v50 = vld [vmem:[#allocation2 + $0x168] sm:$0xff]  ;;  %v1075_v51 = vld [vmem:[#allocation2 + $0x120] sm:$0xff] }
  0x16   :  { %503 = vmatpush.bf16.msra.mxu3 %v1067_v15  ;;  %v1085_v47 = vld [vmem:[#allocation2 + $0x170] sm:$0xff]  ;;  %v1083_v52 = vld [vmem:[#allocation2 + $0x160] sm:$0xff]  ;;  %v1074_v53 = vld [vmem:[#allocation2 + $0x118] sm:$0xff] }
  0x17   :  { %462 = vmatpush.bf16.msra.mxu0 %v1042_v16  ;;  %v47_v54 = vld [vmem:[%s1299_s0 + $0x30] sm:$0xff]  ;;  %v54_v55 = vld [vmem:[%s1299_s0 + $0x68] sm:$0xff]  ;;  %v1082_v56 = vld [vmem:[#allocation2 + $0x158] sm:$0xff] }
  0x18   :  { %476 = vmatpush.bf16.msra.mxu1 %v1050_v17  ;;  %v61_v57 = vpack.c.bf16 %v54_v55, %v47_v54  ;;  %v1073_v58 = vld [vmem:[#allocation2 + $0x110] sm:$0xff]  ;;  %v1072_v60 = vld [vmem:[#allocation2 + $0x108] sm:$0xff]  ;;  %v1071_v62 = vld [vmem:[#allocation2 + $0x100] sm:$0xff] }
  0x19   :  { %490 = vmatpush.bf16.msra.mxu2 %v1058_v18  ;;  %v1081_v59 = vld [vmem:[#allocation2 + $0x150] sm:$0xff]  ;;  %v1080_v61 = vld [vmem:[#allocation2 + $0x148] sm:$0xff]  ;;  %v45_v63 = vld [vmem:[%s1299_s0 + $0x20] sm:$0xff] }
  0x1a   :  { %504 = vmatpush.bf16.msra.mxu3 %v1066_v19  ;;  %v52_v0 = vld [vmem:[%s1299_s0 + $0x58] sm:$0xff]  ;;  %v1079_v1 = vld [vmem:[#allocation2 + $0x140] sm:$0xff]  ;;  %v46_v2 = vld [vmem:[%s1299_s0 + $0x28] sm:$0xff] }
  0x1b   :  { %463 = vmatpush.bf16.msra.mxu0 %v1041_v20  ;;  %v53_v3 = vld [vmem:[%s1299_s0 + $0x60] sm:$0xff]  ;;  %v59_v4 = vpack.c.bf16 %v52_v0, %v45_v63  ;;  %v1095_v6 = vld [vmem:[%s1301_s2 + $0x38] sm:$0xff]  ;;  %v1094_v7 = vld [vmem:[%s1301_s2 + $0x30] sm:$0xff]  ;;  %s766_s0 = sshll.u32 %s1305_s6, 4  ;;  %s767_s0 = int_to_ptr.hbm [resolvable:$true] %s766_s0 }
  0x1c   :  { %477 = vmatpush.bf16.msra.mxu1 %v1049_v21  ;;  %v60_v5 = vpack.c.bf16 %v53_v3, %v46_v2  ;;  %v1093_v8 = vld [vmem:[%s1301_s2 + $0x28] sm:$0xff]  ;;  %v1092_v9 = vld [vmem:[%s1301_s2 + $0x20] sm:$0xff]  ;;  %v1091_v10 = vld [vmem:[%s1301_s2 + $0x18] sm:$0xff] }
  0x1d   :  { %491 = vmatpush.bf16.msra.mxu2 %v1057_v22  ;;  %v1090_v11 = vld [vmem:[%s1301_s2 + $0x10] sm:$0xff]  ;;  %v1089_v12 = vld [vmem:[%s1301_s2 + $0x8] sm:$0xff]  ;;  %v1088_v15 = vld [vmem:[%s1301_s2] sm:$0xff] }
  0x1e   :  { %505 = vmatpush.bf16.msra.mxu3 %v1065_v23  ;;  %v1099_v17 = vld [vmem:[%s1302_s3 + $0x18] sm:$0xff]  ;;  %v1102_v54 = vld [vmem:[%s1304_s5] sm:$0xff] }
  0x1f   :  { %464 = vmatpush.bf16.msra.mxu0 %v1040_v24 }
  0x20   :  { %478 = vmatpush.bf16.msra.mxu1 %v1048_v25 }
  0x21   :  { %492 = vmatpush.bf16.msra.mxu2 %v1056_v26 }
  0x22   :  { %506 = vmatpush.bf16.msra.mxu3 %v1064_v27 }
  0x23   :  { %465 = vmatpush.bf16.msra.mxu0 %v1039_v28 }
  0x24   :  { %479 = vmatpush.bf16.msra.mxu1 %v1047_v29 }
  0x25   :  { %493 = vmatpush.bf16.msra.mxu2 %v1055_v30 }
  0x26   :  { %507 = vmatpush.bf16.msra.mxu3 %v1063_v39  ;;  %466 = vmatmul.bf16.vlgmr.msra.gmra.mxu0 %v55_v42 }
  0x27   :  { %514 = vmatpush.bf16.msrb.mxu0 %v1078_v31  ;;  %480 = vmatmul.bf16.vlgmr.msra.gmra.mxu1 %v56_v43 }
  0x28   :  { %528 = vmatpush.bf16.msrb.mxu1 %v1086_v36  ;;  %494 = vmatmul.bf16.vlgmr.msra.gmra.mxu2 %v57_v44  ;;  %v1098_v44 = vld [vmem:[%s1302_s3 + $0x10] sm:$0xff] }
  0x29   :  { %508 = vmatmul.bf16.vlgmr.msra.gmra.mxu3 %v58_v46  ;;  %549 = vmatpush.bf16.msrb.mxu2 %v1087_v48  ;;  %v1096_v46 = vld [vmem:[%s1302_s3] sm:$0xff] }
  0x2a   :  { %623 = vmatpush.bf16.msrb.mxu3 %v1095_v6 }
  0x2b   :  { %515 = vmatpush.bf16.msrb.mxu0 %v1077_v45  ;;  %v1097_v45 = vld [vmem:[%s1302_s3 + $0x8] sm:$0xff] }
  0x2c   :  { %529 = vmatpush.bf16.msrb.mxu1 %v1085_v47  ;;  %v1101_v47 = vld [vmem:[%s1303_s4 + $0x8] sm:$0xff] }
  0x2d   :  { %680 = vmatpush.bf16.msra.mxu2 %v1099_v17 }
  0x2e   :  { %624 = vmatpush.bf16.msrb.mxu3 %v1094_v7 }
  0x2f   :  { %516 = vmatpush.bf16.msrb.mxu0 %v1076_v49 }
  0x30   :  { %530 = vmatpush.bf16.msrb.mxu1 %v1084_v50 }
  0x31   :  { %681 = vmatpush.bf16.msra.mxu2 %v1098_v44 }
  0x32   :  { %625 = vmatpush.bf16.msrb.mxu3 %v1093_v8 }
  0x33   :  { %517 = vmatpush.bf16.msrb.mxu0 %v1075_v51 }
  0x34   :  { %531 = vmatpush.bf16.msrb.mxu1 %v1083_v52 }
  0x35   :  { %682 = vmatpush.bf16.msra.mxu2 %v1097_v45 }
  0x36   :  { %626 = vmatpush.bf16.msrb.mxu3 %v1092_v9 }
  0x37   :  { %518 = vmatpush.bf16.msrb.mxu0 %v1074_v53  ;;  %v1100_v53 = vld [vmem:[%s1303_s4] sm:$0xff]  ;;  %s1162_s4 = smov [#allocation5]  }
  0x38   :  { %532 = vmatpush.bf16.msrb.mxu1 %v1082_v56  ;;  %975 = vmatmul.msk.bf16.vlgmr.msrb.gmra.mxu2 %vm454_vm0, %v61_v57  ;;  %s764_s5 = sshll.u32 %s1162_s4, 4  ;;  %s765_s5 = int_to_ptr.vmem [resolvable:$true] %s764_s5 }
  0x39   :  { %683 = vmatpush.bf16.msra.mxu2 %v1096_v46 }
  0x3a   :  { %627 = vmatpush.bf16.msrb.mxu3 %v1091_v10 }
  0x3b   :  { %519 = vmatpush.bf16.msrb.mxu0 %v1073_v58 }
  0x3c   :  { %533 = vmatpush.bf16.msrb.mxu1 %v1081_v59 }
  0x3e   :  { %628 = vmatpush.bf16.msrb.mxu3 %v1090_v11 }
  0x3f   :  { %520 = vmatpush.bf16.msrb.mxu0 %v1072_v60 }
  0x40   :  { %534 = vmatpush.bf16.msrb.mxu1 %v1080_v61 }
  0x42   :  { %629 = vmatpush.bf16.msrb.mxu3 %v1089_v12 }
  0x43   :  { %521 = vmatpush.bf16.msrb.mxu0 %v1071_v62 }
  0x44   :  { %535 = vmatpush.bf16.msrb.mxu1 %v1079_v1 }
  0x46   :  { %522 = vmatmul.bf16.vlgmr.msrb.gmra.mxu0 %v59_v4  ;;  %630 = vmatpush.bf16.msrb.mxu3 %v1088_v15 }
  0x47   :  { %536 = vmatmul.bf16.vlgmr.msrb.gmra.mxu1 %v60_v5  ;;  %719 = vmatpush.bf16.msra.mxu0 %v1101_v47 }
  0x48   :  { %748 = vmatpush.bf16.msra.mxu1 %v1102_v54 }
  0x4b   :  { %720 = vmatpush.bf16.msra.mxu0 %v1100_v53 }
  0xa3   :  { %v467_v13 = vpop.f32.mrf.mxu0 }
  0xa4   :  { %v481_v14 = vpop.f32.mrf.mxu1 }
  0xa5   :  { %v482_v19 = vadd.f32 %v481_v14, %v467_v13 }
  0xab   :  { %v495_v16 = vpop.f32.mrf.mxu2  ;;  %v469_v18 = vpop.f32.mrf.mxu0 }
  0xac   :  { %v483_v20 = vpop.f32.mrf.mxu1  ;;  %v509_v21 = vpop.f32.mrf.mxu3  ;;  %v496_v23 = vadd.f32 %v495_v16, %v482_v19 }
  0xad   :  { %v484_v24 = vadd.f32 %v483_v20, %v469_v18 }
  0xae   :  { %v510_v26 = vadd.f32 %v509_v21, %v496_v23 }
  0xb3   :  { %v497_v22 = vpop.f32.mrf.mxu2 }
  0xb4   :  { %v498_v29 = vadd.f32 %v497_v22, %v484_v24  ;;  %v511_v31 = vpop.f32.mrf.mxu3 }
  0xb6   :  { %v512_v32 = vadd.f32 %v511_v31, %v498_v29 }
  0xbb   :  { %v551_v28 = vpop.f32.mrf.mxu2 }
  0xc3   :  { %v523_v25 = vpop.f32.mrf.mxu0  ;;  %v553_v39 = vpop.f32.mrf.mxu2 }
  0xc4   :  { %v537_v27 = vpop.f32.mrf.mxu1  ;;  %v524_v30 = vadd.f32 %v523_v25, %v510_v26 }
  0xc6   :  { %v538_v33 = vadd.f32 %v537_v27, %v524_v30 }
  0xc8   :  { %v552_v37 = vadd.f32 %v551_v28, %v538_v33 }
  0xca   :  { %v556_v41 = vmax.f32 %v552_v37, 0.0 }
  0xcb   :  { %v525_v34 = vpop.f32.mrf.mxu0 }
  0xcc   :  { %v526_v35 = vadd.f32 %v525_v34, %v512_v32  ;;  %v539_v36 = vpop.f32.mrf.mxu1 }
  0xce   :  { %v540_v38 = vadd.f32 %v539_v36, %v526_v35 }
  0xd0   :  { %v554_v40 = vadd.f32 %v553_v39, %v540_v38 }
  0xd2   :  { %v557_v42 = vmax.f32 %v554_v40, 0.0 }
  0xd4   :  { %v558_v43 = vpack.c.bf16 %v557_v42, %v556_v41 }
  0xd6   :  { %631 = vmatmul.bf16.vlgmr.msrb.gmra.mxu3 %v558_v43 }
 0x159   :  { %v632_v48 = vpop.f32.mrf.mxu3 }
 0x15a   :  { %v637_v50 = vmax.f32 %v632_v48, 0.0 }
 0x161   :  { %v634_v49 = vpop.f32.mrf.mxu3 }
 0x162   :  { %v638_v51 = vmax.f32 %v634_v49, 0.0 }
 0x164   :  { %v639_v52 = vpack.c.bf16 %v638_v51, %v637_v50 }
 0x166   :  { %1024 = vmatmul.msk.bf16.vlgmr.msra.gmra.mxu2 %vm672_vm1, %v639_v52 }
 0x1e9   :  { %v685_v55 = vpop.f32.mrf.mxu2 }
 0x1ea   :  { %v690_v57 = vmax.f32 %v685_v55, 0.0 }
 0x1f1   :  { %v687_v56 = vpop.f32.mrf.mxu2 }
 0x1f2   :  { %v691_v58 = vmax.f32 %v687_v56, 0.0 }
 0x1f4   :  { %v692_v59 = vpack.c.bf16 %v691_v58, %v690_v57 }
 0x1f6   :  { %1033 = vmatmul.msk.bf16.vlgmr.msra.gmra.mxu0 %vm709_vm2, %v692_v59 }
 0x273   :  { %v722_v60 = vpop.f32.mrf.mxu0 }
 0x274   :  { %v727_v62 = vmax.f32 %v722_v60, 0.0 }
 0x27b   :  { %v724_v61 = vpop.f32.mrf.mxu0 }
 0x27c   :  { %v728_v63 = vmax.f32 %v724_v61, 0.0 }
 0x27e   :  { %v729_v0 = vpack.c.bf16 %v728_v63, %v727_v62 }
 0x280   :  { %1038 = vmatmul.msk.bf16.vlgmr.msra.gmra.mxu1 %vm454_vm0, %v729_v0 }
 0x2fd   :  { %v750_v1 = vpop.f32.mrf.mxu1 }
 0x2fe   :  { %v755_v2 = vpack.c.bf16 %v750_v1, %v750_v1 }
 0x300   :  { %758 = vst.msk [vmem:[#allocation5] sm:$0xf] %vm757_vm3, %v755_v2 }
 0x305   :  { %v752_v3 = vpop.f32.mrf.mxu1 }
 0x306   :  { %v756_v4 = vpack.c.bf16 %v752_v3, %v752_v3 }
 0x308   :  { %759 = vst.msk [vmem:[#allocation5 + $0x4] sm:$0xf] %vm757_vm3, %v756_v4 }
 0x309   :  { %772 = dma.vmem_to_hbm [thread:$0]  %s765_s5, 128, %s767_s0, [#allocation4], %s1160_s26, %s1160_s26, %s1161_s27  }
 0x30a   :  { %1157 = dma.done.wait [#allocation4], 128  }
 0x30b   :  { %1158 = vsyncadd [#allocation4], 4294967168 }
 0x30c   :  { %777 = vsyncpa [#allocation3], 1 }
 0x30d   :  { %778 = vsyncpa [#allocation4], 1 }

</bundles_post_ra>
